<compile_context>
chip_gen: v5e
topology: v5e:2x2
jax: 0.10.0
libtpu: 0.0.40
codegen_flags: <defaults>
</compile_context>

<pallas_src>
import functools
import math

import jax
import jax.numpy as jnp
from jax.experimental import pallas as pl
from jax.experimental.pallas import tpu as pltpu


def _fourier_kernel(x_ref, w_ref, o_ref, *, out_features, half_out):
    # MXU matmul on the folded operands: [TM, K] @ [K, L] -> [TM, L], f32 acc.
    # 2*pi is already folded into w_ref by the wrapper.
    f = jnp.dot(x_ref[...], w_ref[...], preferred_element_type=jnp.float32)
    # Lane-index select instead of a lane-axis concat (VALU select, no XLU).
    lane = jax.lax.broadcasted_iota(jnp.int32, f.shape, dimension=1)
    cos_lane = (lane % out_features) < half_out
    o_ref[...] = jnp.where(cos_lane, jnp.cos(f), jnp.sin(f)).astype(o_ref.dtype)


def _fold_factor(n, in_features, out_features):
    """Logical rows folded per stored row so the stored tile is lane-dense."""
    r = 128 // math.gcd(out_features, 128)            # lane-dense output
    if (r * in_features) % 128 != 0:                  # try lane-dense K as well
        r2 = r * (128 // math.gcd(r * in_features, 128))
        if r2 * out_features <= 512 and r2 * in_features <= 1024:
            r = r2
    if r > 1 and n % r != 0:                          # free reshape needs n % r == 0
        r = 1
    return r


def fourier_features(x, weight, *, row_tile=16384, out_dtype=jnp.float32):
    """x: [..., in_features]; weight: [out_features//2, in_features]."""
    *lead, in_features = x.shape
    half_out, in_w = weight.shape
    assert in_w == in_features
    out_features = 2 * half_out

    n = 1
    for d in lead:
        n *= d
    x2d = x.reshape(n, in_features)                   # native dtype, no wrapper cast

    # Fold 2*pi into the tiny weight once, duplicate so cos and sin come from
    # one wide matmul, then block-diagonalize so r rows are packed per stored
    # row (row-major bytes == desired [n, out] layout).
    w2 = (2.0 * math.pi) * weight.T.astype(jnp.float32)        # [in, out/2]
    w2 = jnp.concatenate([w2, w2], axis=1)                     # [in, out]
    r = _fold_factor(n, in_features, out_features)
    w_bd = jnp.kron(jnp.eye(r, dtype=jnp.float32), w2) if r > 1 else w2
    m = n // r
    k = r * in_features
    n_lanes = r * out_features
    x_fold = x2d.reshape(m, k)                                 # free reshape

    # Row tile (in folded rows): large to amortize per-step overhead, multiple
    # of 8, capped by a double-buffered VMEM budget safe on every generation.
    x_item = jnp.dtype(x_fold.dtype).itemsize
    o_item = jnp.dtype(out_dtype).itemsize
    per_row_bytes = 2 * (k * x_item + n_lanes * o_item)        # double-buffered
    budget = 24 << 20
    tm = max(8, ((row_tile // r) // 8) * 8)
    tm = min(tm, max(8, (budget // per_row_bytes) // 8 * 8))
    if m <= tm:
        tm = m                        # single full-extent block
    grid = (pl.cdiv(m, tm),)          # ragged last block masked by Pallas

    w_bytes = int(w_bd.size) * 4
    vmem_need = tm * per_row_bytes + 2 * w_bytes
    vmem_limit = int(min(vmem_need + (8 << 20), 56 << 20))

    cost = pl.CostEstimate(
        flops=2 * m * k * n_lanes,
        transcendentals=m * n_lanes,
        bytes_accessed=int(x_fold.size) * x_item + w_bytes + m * n_lanes * o_item,
    )

    kernel = functools.partial(
        _fourier_kernel, out_features=out_features, half_out=half_out
    )

    out = pl.pallas_call(
        kernel,
        out_shape=jax.ShapeDtypeStruct((m, n_lanes), out_dtype),
        grid=grid,
        in_specs=[
            pl.BlockSpec((tm, k), lambda i: (i, 0)),
            # Tiny weight stays VMEM-resident across all grid steps.
            pl.BlockSpec((k, n_lanes), lambda i: (0, 0)),
        ],
        out_specs=pl.BlockSpec((tm, n_lanes), lambda i: (i, 0)),
        compiler_params=pltpu.CompilerParams(
            dimension_semantics=("parallel",),
            vmem_limit_bytes=vmem_limit,
        ),
        cost_estimate=cost,
    )(x_fold, w_bd)

    # Free reshapes: row-major bytes of [m, r*out] are exactly [n, out].
    return out.reshape(n, out_features).reshape(*lead, out_features)


if __name__ == "__main__":
    key = jax.random.PRNGKey(0)
    k_w, k_x = jax.random.split(key)

    in_features = 32
    out_features = 64  # must be even
    std = 0.2

    # Deterministic synthetic parameter (matches nn.Parameter(randn * std) shape).
    weight = (
        jax.random.normal(k_w, (out_features // 2, in_features), jnp.float32) * std
    )

    # Small input: batch=2, seq=8, hidden=in_features -> exercises the folded
    # lane-dense path (r=4, [4*in, 256] block-diagonal weight).
    x = jax.random.normal(k_x, (2, 8, in_features), jnp.float32)
    out = jax.block_until_ready(fourier_features(x, weight))

    f_ref = 2.0 * math.pi * (x @ weight.T)
    ref = jnp.concatenate([jnp.cos(f_ref), jnp.sin(f_ref)], axis=-1)
    assert out.shape == (2, 8, out_features), out.shape
    assert jnp.allclose(out, ref, atol=1e-5, rtol=1e-5), float(
        jnp.max(jnp.abs(out - ref))
    )

    # Row count not divisible by the fold factor -> exercises the r=1 fallback
    # (full-extent single block, no pad / slice needed).
    x_odd = jax.random.normal(jax.random.PRNGKey(1), (3, 7, in_features), jnp.float32)
    out_odd = jax.block_until_ready(fourier_features(x_odd, weight))
    f_odd = 2.0 * math.pi * (x_odd @ weight.T)
    ref_odd = jnp.concatenate([jnp.cos(f_odd), jnp.sin(f_odd)], axis=-1)
    assert jnp.allclose(out_odd, ref_odd, atol=1e-5, rtol=1e-5), float(
        jnp.max(jnp.abs(out_odd - ref_odd))
    )

    print("KERNEL_OK")
</pallas_src>

<mosaic_0001>
module attributes {stable_mosaic.version = 11 : i64} {
  func.func @_fourier_kernel(%arg0: i32, %arg1: memref<4x128xf32, #tpu.memory_space<vmem>>, %arg2: memref<128x256xf32, #tpu.memory_space<vmem>>, %arg3: memref<4x256xf32, #tpu.memory_space<vmem>>) attributes {dimension_semantics = [#tpu.dimension_semantics<parallel>], iteration_bounds = array<i64: 1>, scalar_prefetch = 0 : i64, scratch_operands = 0 : i64, tpu.core_type = #tpu.core_type<tc>, window_params = [{transform_indices = @transform_0, window_bounds = array<i64: 4, 128>}, {pipeline_mode = #tpu.pipeline_mode<synchronous>, transform_indices = @transform_1, window_bounds = array<i64: 128, 256>}, {transform_indices = @transform_2, window_bounds = array<i64: 4, 256>}]} {
    %c0 = arith.constant 0 : index
    %c0_0 = arith.constant 0 : index
    %0 = vector.load %arg1[%c0, %c0_0] : memref<4x128xf32, #tpu.memory_space<vmem>>, vector<4x128xf32>
    %c0_1 = arith.constant 0 : index
    %c0_2 = arith.constant 0 : index
    %1 = vector.load %arg2[%c0_1, %c0_2] : memref<128x256xf32, #tpu.memory_space<vmem>>, vector<128x256xf32>
    %cst = arith.constant dense<0.000000e+00> : vector<4x256xf32>
    %2 = tpu.matmul %0, %1, %cst {dimension_numbers = #tpu.dot_dimension_numbers<[1], [0], [0], [1], [0, 0, 1, 1], [], []>} : vector<4x128xf32>, vector<128x256xf32>, vector<4x256xf32> -> vector<4x256xf32>
    %3 = tpu.iota {dimensions = array<i32: 1>} : vector<4x256xi32>
    %c64_i32 = arith.constant 64 : i32
    %c0_i32 = arith.constant 0 : i32
    %4 = arith.cmpi eq, %c64_i32, %c0_i32 : i32
    %c1_i32 = arith.constant 1 : i32
    %5 = arith.select %4, %c1_i32, %c64_i32 : i32
    %6 = vector.broadcast %5 : i32 to vector<4x256xi32>
    %7 = arith.remsi %3, %6 : vector<4x256xi32>
    %c0_i32_3 = arith.constant 0 : i32
    %8 = vector.broadcast %c0_i32_3 : i32 to vector<4x256xi32>
    %9 = arith.cmpi ne, %7, %8 : vector<4x256xi32>
    %c0_i32_4 = arith.constant 0 : i32
    %10 = vector.broadcast %c0_i32_4 : i32 to vector<4x256xi32>
    %11 = arith.cmpi slt, %7, %10 : vector<4x256xi32>
    %c0_i32_5 = arith.constant 0 : i32
    %12 = arith.cmpi slt, %5, %c0_i32_5 : i32
    %13 = vector.broadcast %12 : i1 to vector<4x256xi1>
    %14 = vector.broadcast %13 : vector<4x256xi1> to vector<4x256xi1>
    %15 = arith.xori %11, %14 : vector<4x256xi1>
    %16 = arith.andi %15, %9 : vector<4x256xi1>
    %17 = vector.broadcast %5 : i32 to vector<4x256xi32>
    %18 = arith.addi %7, %17 : vector<4x256xi32>
    %19 = arith.select %16, %18, %7 : vector<4x256xi1>, vector<4x256xi32>
    %c32_i32 = arith.constant 32 : i32
    %20 = vector.broadcast %c32_i32 : i32 to vector<4x256xi32>
    %21 = arith.cmpi slt, %19, %20 : vector<4x256xi32>
    %22 = math.cos %2 : vector<4x256xf32>
    %23 = math.sin %2 : vector<4x256xf32>
    %24 = arith.select %21, %22, %23 : vector<4x256xi1>, vector<4x256xf32>
    %c0_6 = arith.constant 0 : index
    %c0_7 = arith.constant 0 : index
    %25 = vector.load %arg3[%c0_6, %c0_7] : memref<4x256xf32, #tpu.memory_space<vmem>>, vector<4x256xf32>
    tpu.vector_store %arg3[%c0_6, %c0_7], %24 {strides = array<i32>} : memref<4x256xf32, #tpu.memory_space<vmem>>, vector<4x256xf32>,
    return
  }
  func.func @transform_0(%arg0: i32) -> (i32, i32) {
    %c0_i32 = arith.constant 0 : i32
    %c0_i32_0 = arith.constant 0 : i32
    return %arg0, %c0_i32 : i32, i32
  }
  func.func @transform_1(%arg0: i32) -> (i32, i32) {
    %c0_i32 = arith.constant 0 : i32
    %c0_i32_0 = arith.constant 0 : i32
    %c0_i32_1 = arith.constant 0 : i32
    return %c0_i32, %c0_i32_0 : i32, i32
  }
  func.func @transform_2(%arg0: i32) -> (i32, i32) {
    %c0_i32 = arith.constant 0 : i32
    %c0_i32_0 = arith.constant 0 : i32
    return %arg0, %c0_i32 : i32, i32
  }
}

</mosaic_0001>

<bundles_post_ra>
// kernel: tpu_custom_call.1
= control target key start
LH: loop header
LB: loop body
LE: loop exit
PB: predicated region body
PF: predicated region fallthrough
CT: control target
= control target key end

     0   :  { %7 = vsyncpa [#allocation3], 0  ;;  %s1112_s0 = inlined_call_operand.hbm [shape: f32[4,128], index: 0, kind: input, shape index: {}]   ;;  %s1113_s1 = inlined_call_operand.hbm [shape: f32[128,256], index: 1, kind: input, shape index: {}]   ;;  %s1114_s2 = inlined_call_operand.hbm [shape: f32[4,256], index: 2, kind: output, shape index: {}]  }
   0x1   :  { %8 = vsyncpa [#allocation6], 0 }
   0x2   :  { %9 = vsyncpa [#allocation4], 0  ;;  %s15_s11 = sshll.u32 %s1112_s0, 4  ;;  %s891_s12 = smov [#allocation2]   ;;  %s16_s11 = int_to_ptr.hbm [resolvable:$true] %s15_s11 }
   0x3   :  { %s17_s13 = sshll.u32 %s891_s12, 4  ;;  %s25_s16 = sshll.u32 %s1113_s1, 4  ;;  %s18_s13 = int_to_ptr.vmem [resolvable:$true] %s17_s13  ;;  %s26_s16 = int_to_ptr.hbm [resolvable:$true] %s25_s16 }
   0x4   :  { %20 = dma.hbm_to_vmem [thread:$0]  %s16_s11, 64, %s18_s13, [#allocation3]  }
   0x5   :  { %s892_s17 = smov [#allocation5]   ;;  %s893_s19 = smov 256  }
   0x6   :  { %s27_s18 = sshll.u32 %s892_s17, 4  ;;  %s894_s20 = smov 16   ;;  %s28_s18 = int_to_ptr.vmem [resolvable:$true] %s27_s18 }
   0x7   :  { %33 = dma.hbm_to_vmem [thread:$0]  %s26_s16, 4096, %s28_s18, [#allocation6], %s893_s19, %s893_s19, %s894_s20  }
   0x8   :  { %885 = dma.done.wait [#allocation3], 64  }
   0x9   :  { %886 = vsyncadd [#allocation3], 4294967232 }
   0xa   :  { %887 = dma.done.wait [#allocation6], 4096  }
   0xb   :  { %888 = vsyncadd [#allocation6], 4294963200  ;;  %v73_v0 = vld [vmem:[#allocation5 + $0xf0] sm:$0xff]  ;;  %v74_v1 = vld [vmem:[#allocation5 + $0xf8] sm:$0xff]  ;;  %v895_v55 = vmov 683565275  }
   0xc   :  { %v71_v2 = vld [vmem:[#allocation5 + $0xe0] sm:$0xff]  ;;  %75 = vmatpush.msra.mxu0 %v73_v0  ;;  %95 = vmatpush.msra.mxu1 %v74_v1  ;;  %v72_v3 = vld [vmem:[#allocation5 + $0xe8] sm:$0xff]  ;;  %v69_v4 = vld [vmem:[#allocation5 + $0xd0] sm:$0xff]  ;;  %v896_v57 = vmov 2475754826   ;;  %s902_s0 = smov [#allocation7]  }
   0xd   :  { %v70_v5 = vld [vmem:[#allocation5 + $0xd8] sm:$0xff]  ;;  %v67_v6 = vld [vmem:[#allocation5 + $0xc0] sm:$0xff]  ;;  %v68_v7 = vld [vmem:[#allocation5 + $0xc8] sm:$0xff]  ;;  %v897_v59 = vmov 2131351028   ;;  %s776_s1 = sshll.u32 %s902_s0, 4  ;;  %s777_s1 = int_to_ptr.vmem [resolvable:$true] %s776_s1 }
   0xe   :  { %76 = vmatpush.msra.mxu0 %v71_v2  ;;  %96 = vmatpush.msra.mxu1 %v72_v3  ;;  %v65_v8 = vld [vmem:[#allocation5 + $0xb0] sm:$0xff]  ;;  %v66_v9 = vld [vmem:[#allocation5 + $0xb8] sm:$0xff]  ;;  %v63_v10 = vld [vmem:[#allocation5 + $0xa0] sm:$0xff]  ;;  %v898_v62 = vmov 2102212464   ;;  %s778_s23 = sshll.u32 %s1114_s2, 4  ;;  %s779_s23 = int_to_ptr.hbm [resolvable:$true] %s778_s23 }
   0xf   :  { %v64_v11 = vld [vmem:[#allocation5 + $0xa8] sm:$0xff]  ;;  %v61_v12 = vld [vmem:[#allocation5 + $0x90] sm:$0xff]  ;;  %v62_v13 = vld [vmem:[#allocation5 + $0x98] sm:$0xff]  ;;  %v899_v0 = vmov 920167782  }
  0x10   :  { %77 = vmatpush.msra.mxu0 %v69_v4  ;;  %97 = vmatpush.msra.mxu1 %v70_v5  ;;  %v59_v14 = vld [vmem:[#allocation5 + $0x80] sm:$0xff]  ;;  %v60_v15 = vld [vmem:[#allocation5 + $0x88] sm:$0xff]  ;;  %v57_v16 = vld [vmem:[#allocation5 + $0x70] sm:$0xff] }
  0x11   :  { %v58_v17 = vld [vmem:[#allocation5 + $0x78] sm:$0xff]  ;;  %v55_v18 = vld [vmem:[#allocation5 + $0x60] sm:$0xff]  ;;  %v56_v19 = vld [vmem:[#allocation5 + $0x68] sm:$0xff] }
  0x12   :  { %78 = vmatpush.msra.mxu0 %v67_v6  ;;  %98 = vmatpush.msra.mxu1 %v68_v7  ;;  %v53_v20 = vld [vmem:[#allocation5 + $0x50] sm:$0xff]  ;;  %v54_v21 = vld [vmem:[#allocation5 + $0x58] sm:$0xff]  ;;  %v51_v22 = vld [vmem:[#allocation5 + $0x40] sm:$0xff]  ;;  %v900_v7 = vmov 1326507024  }
  0x13   :  { %v52_v23 = vld [vmem:[#allocation5 + $0x48] sm:$0xff]  ;;  %v49_v24 = vld [vmem:[#allocation5 + $0x30] sm:$0xff]  ;;  %v50_v25 = vld [vmem:[#allocation5 + $0x38] sm:$0xff] }
  0x14   :  { %79 = vmatpush.msra.mxu0 %v65_v8  ;;  %99 = vmatpush.msra.mxu1 %v66_v9  ;;  %v47_v26 = vld [vmem:[#allocation5 + $0x20] sm:$0xff]  ;;  %v48_v27 = vld [vmem:[#allocation5 + $0x28] sm:$0xff]  ;;  %v45_v28 = vld [vmem:[#allocation5 + $0x10] sm:$0xff] }
  0x15   :  { %v46_v29 = vld [vmem:[#allocation5 + $0x18] sm:$0xff]  ;;  %v43_v30 = vld [vmem:[#allocation5] sm:$0xff]  ;;  %v44_v31 = vld [vmem:[#allocation5 + $0x8] sm:$0xff] }
  0x16   :  { %80 = vmatpush.msra.mxu0 %v63_v10  ;;  %100 = vmatpush.msra.mxu1 %v64_v11  ;;  %v42_v32 = vld [vmem:[#allocation2] sm:$0xf] }
  0x18   :  { %81 = vmatpush.msra.mxu0 %v61_v12  ;;  %101 = vmatpush.msra.mxu1 %v62_v13 }
  0x1a   :  { %82 = vmatpush.msra.mxu0 %v59_v14  ;;  %102 = vmatpush.msra.mxu1 %v60_v15 }
  0x1c   :  { %83 = vmatpush.msra.mxu0 %v57_v16  ;;  %103 = vmatpush.msra.mxu1 %v58_v17 }
  0x1e   :  { %84 = vmatpush.msra.mxu0 %v55_v18  ;;  %104 = vmatpush.msra.mxu1 %v56_v19 }
  0x20   :  { %85 = vmatpush.msra.mxu0 %v53_v20  ;;  %105 = vmatpush.msra.mxu1 %v54_v21 }
  0x22   :  { %86 = vmatpush.msra.mxu0 %v51_v22  ;;  %106 = vmatpush.msra.mxu1 %v52_v23 }
  0x24   :  { %87 = vmatpush.msra.mxu0 %v49_v24  ;;  %107 = vmatpush.msra.mxu1 %v50_v25 }
  0x26   :  { %88 = vmatpush.msra.mxu0 %v47_v26  ;;  %108 = vmatpush.msra.mxu1 %v48_v27 }
  0x28   :  { %89 = vmatpush.msra.mxu0 %v45_v28  ;;  %109 = vmatpush.msra.mxu1 %v46_v29 }
  0x2a   :  { %90 = vmatpush.msra.mxu0 %v43_v30  ;;  %110 = vmatpush.msra.mxu1 %v44_v31 }
  0x2b   :  { %91 = vmatmul.f32.vlgmr.msra.gmra.mxu0 %v42_v32  ;;  %111 = vmatmul.f32.vlgmr.msra.gmra.mxu1 %v42_v32 }
  0xa8   :  { %v924_v33 = vpop.f32.mrf.mxu0  ;;  %v926_v34 = vpop.f32.mrf.mxu1 }
  0xa9   :  { %v144_v35 = vand.u32 2147483647, %v924_v33  ;;  %v147_v36 = vand.u32 2139095040, %v924_v33  ;;  %v301_v37 = vand.u32 2139095040, %v926_v34  ;;  %v298_v39 = vand.u32 2147483647, %v926_v34 }
  0xab   :  { %v148_v38 = vshrl.u32 %v147_v36, 23  ;;  %v151_v40 = vand.u32 8388607, %v144_v35  ;;  %v302_v41 = vshrl.u32 %v301_v37, 23  ;;  %v305_v45 = vand.u32 8388607, %v298_v39 }
  0xad   :  { %v789_v42 = vadd.s32 4294967169, %v148_v38  ;;  %v792_v43 = vadd.s32 4294967169, %v302_v41  ;;  %v152_v46 = vor.u32 8388608, %v151_v40  ;;  %v306_v50 = vor.u32 8388608, %v305_v45 }
  0xaf   :  { %v154_v44 = vadd.s32 1, %v789_v42  ;;  %v308_v47 = vadd.s32 1, %v792_v43  ;;  %v936_v52 = vshll.u32 %v152_v46, 8  ;;  %v946_v5 = vshll.u32 %v306_v50, 8 }
  0xb1   :  { %vm155_vm0 = vcmp.gt.s32.totalorder %v154_v44, 0  ;;  %vm309_vm1 = vcmp.gt.s32.totalorder %v308_v47, 0  ;;  %v193_v9 = vand.u32 65535, %v936_v52  ;;  %v194_v10 = vshrl.u32 %v936_v52, 16 }
  0xb2   :  { %v156_v48 = vsel %vm155_vm0, %v154_v44, 0  ;;  %v310_v51 = vsel %vm309_vm1, %v308_v47, 0 }
  0xb3   :  { %v158_v49 = vand.u32 31, %v156_v48  ;;  %v938_v53 = vand.u32 31, %v310_v51  ;;  %v941_v61 = vshrl.u32 %v156_v48, 5  ;;  %v981_v41 = vshrl.u32 %v310_v51, 5 }
  0xb5   :  { %v159_v54 = vsub.s32 32, %v158_v49  ;;  %v161_v56 = vshll.u32 %v895_v55, %v158_v49  ;;  %v164_v58 = vshll.u32 %v896_v57, %v158_v49  ;;  %v167_v60 = vshll.u32 %v897_v59, %v158_v49 }
  0xb6   :  { %v170_v63 = vshll.u32 %v898_v62, %v158_v49  ;;  %v173_v1 = vshll.u32 %v899_v0, %v158_v49  ;;  %v953_v14 = vsub.s32 32, %v938_v53  ;;  %vm176_vm2 = vcmp.lt.s32.totalorder %v941_v61, 1 }
  0xb7   :  { %v162_v2 = vshrl.u32 %v896_v57, %v159_v54  ;;  %v165_v3 = vshrl.u32 %v897_v59, %v159_v54  ;;  %v168_v4 = vshrl.u32 %v898_v62, %v159_v54  ;;  %v171_v6 = vshrl.u32 %v899_v0, %v159_v54 }
  0xb8   :  { %v174_v8 = vshrl.u32 %v900_v7, %v159_v54  ;;  %vm177_vm3 = vcmp.lt.s32.totalorder %v941_v61, 2  ;;  %v160_v17 = vshrl.u32 %v895_v55, %v159_v54  ;;  %vm179_vm4 = vcmp.lt.s32.totalorder %v941_v61, 4 }
  0xb9   :  { %v163_v11 = vor.u32 %v162_v2, %v161_v56  ;;  %v166_v12 = vor.u32 %v165_v3, %v164_v58  ;;  %v169_v13 = vor.u32 %v168_v4, %v167_v60  ;;  %v172_v15 = vor.u32 %v171_v6, %v170_v63 }
  0xba   :  { %v175_v16 = vor.u32 %v174_v8, %v173_v1  ;;  %vm178_vm5 = vcmp.lt.s32.totalorder %v941_v61, 3  ;;  %v315_v22 = vshll.u32 %v895_v55, %v938_v53  ;;  %v316_v26 = vshrl.u32 %v896_v57, %v953_v14 }
  0xbb   :  { %v184_v18 = vsel %vm176_vm2, %v163_v11, %v166_v12  ;;  %v188_v19 = vsel %vm176_vm2, %v166_v12, %v169_v13  ;;  %v185_v20 = vsel %vm179_vm4, %v172_v15, 920167782  ;;  %v181_v23 = vsel %vm179_vm4, %v169_v13, 2102212464 }
  0xbc   :  { %v189_v21 = vsel %vm179_vm4, %v175_v16, 1326507024  ;;  %v186_v24 = vsel %vm178_vm5, %v169_v13, %v185_v20  ;;  %v318_v29 = vshll.u32 %v896_v57, %v938_v53  ;;  %v319_v30 = vshrl.u32 %v897_v59, %v953_v14 }
  0xbd   :  { %v190_v25 = vsel %vm178_vm5, %v172_v15, %v189_v21  ;;  %v187_v27 = vsel %vm177_vm3, %v184_v18, %v186_v24  ;;  %v180_v38 = vsel %vm176_vm2, %v160_v17, %v163_v11  ;;  %v182_v40 = vsel %vm178_vm5, %v166_v12, %v181_v23 }
  0xbe   :  { %v191_v28 = vsel %vm177_vm3, %v188_v19, %v190_v25  ;;  %v217_v36 = vand.u32 65535, %v187_v27  ;;  %v218_v37 = vshrl.u32 %v187_v27, 16  ;;  %v983_v42 = vor.u32 %v316_v26, %v315_v22 }
  0xbf   :  { %v195_v31 = vand.u32 65535, %v191_v28  ;;  %v196_v32 = vshrl.u32 %v191_v28, 16  ;;  %v985_v45 = vor.u32 %v319_v30, %v318_v29  ;;  %v322_v46 = vshrl.u32 %v898_v62, %v953_v14 }
  0xc0   :  { %v220_v48 = vmul.u32 %v218_v37, %v193_v9  ;;  %v221_v49 = vmul.u32 %v217_v36, %v194_v10  ;;  %v321_v50 = vshll.u32 %v897_v59, %v938_v53  ;;  %v219_v57 = vmul.u32 %v217_v36, %v193_v9 }
  0xc1   :  { %v198_v43 = vmul.u32 %v196_v32, %v193_v9  ;;  %v199_v44 = vmul.u32 %v195_v31, %v194_v10  ;;  %v197_v47 = vmul.u32 %v195_v31, %v193_v9  ;;  %v200_v54 = vmul.u32 %v196_v32, %v194_v10 }
  0xc2   :  { %v222_v58 = vmul.u32 %v218_v37, %v194_v10  ;;  %v223_v1 = vshll.u32 %v220_v48, 16  ;;  %v225_v3 = vshll.u32 %v221_v49, 16  ;;  %v990_v4 = vor.u32 %v322_v46, %v321_v50 }
  0xc3   :  { %v201_v56 = vshll.u32 %v198_v43, 16  ;;  %v202_v51 = vshrl.u32 %v198_v43, 16  ;;  %v203_v60 = vshll.u32 %v199_v44, 16  ;;  %v204_v63 = vshrl.u32 %v199_v44, 16 }
  0xc4   :  { %v901_v6 = vmov 0   ;;  %vm227_vm7 = vc.u32 %v219_v57, %v223_v1  ;;  %v229_v11 = vadd.s32 %v223_v1, %v219_v57  ;;  %v325_v59 = vshrl.u32 %v899_v0, %v953_v14 }
  0xc5   :  { %vm205_vm6 = vc.u32 %v197_v47, %v201_v56  ;;  %v207_v2 = vadd.s32 %v201_v56, %v197_v47  ;;  %v228_v9 = vsel %vm227_vm7, 1, %v901_v6  ;;  %v324_v10 = vshll.u32 %v898_v62, %v938_v53 }
  0xc6   :  { %v206_v8 = vsel %vm205_vm6, 1, %v901_v6  ;;  %v230_v15 = vadd.s32 %v228_v9, %v222_v58  ;;  %vm231_vm9 = vc.u32 %v229_v11, %v225_v3  ;;  %v327_v16 = vshll.u32 %v899_v0, %v938_v53 }
  0xc7   :  { %v208_v12 = vadd.s32 %v206_v8, %v200_v54  ;;  %vm209_vm8 = vc.u32 %v207_v2, %v203_v60  ;;  %v232_v18 = vsel %vm231_vm9, 1, %v901_v6  ;;  %v326_v19 = vor.u32 %v325_v59, %v324_v10 }
  0xc8   :  { %v210_v13 = vsel %vm209_vm8, 1, %v901_v6  ;;  %v328_v20 = vshrl.u32 %v900_v7, %v953_v14  ;;  %v224_v21 = vshrl.u32 %v220_v48, 16  ;;  %v226_v22 = vshrl.u32 %v221_v49, 16 }
  0xc9   :  { %v212_v17 = vadd.s32 %v210_v13, %v208_v12  ;;  %v1004_v23 = vadd.s32 %v229_v11, %v225_v3  ;;  %v234_v24 = vadd.s32 %v232_v18, %v230_v15  ;;  %vm330_vm10 = vcmp.lt.s32.totalorder %v981_v41, 1 }
  0xca   :  { %v329_v25 = vor.u32 %v328_v20, %v327_v16  ;;  %vm333_vm11 = vcmp.lt.s32.totalorder %v981_v41, 4  ;;  %vm332_vm12 = vcmp.lt.s32.totalorder %v981_v41, 3  ;;  %v338_v53 = vsel %vm330_vm10, %v983_v42, %v985_v45 }
  0xcb   :  { %v213_v62 = vadd.s32 %v212_v17, %v202_v51  ;;  %v235_v26 = vadd.s32 %v234_v24, %v224_v21  ;;  %v339_v0 = vsel %vm333_vm11, %v326_v19, 920167782  ;;  %vm331_vm13 = vcmp.lt.s32.totalorder %v981_v41, 2 }
  0xcc   :  { %v340_v27 = vsel %vm332_vm12, %v990_v4, %v339_v0  ;;  %v342_v28 = vsel %vm330_vm10, %v985_v45, %v990_v4  ;;  %v183_v29 = vsel %vm177_vm3, %v180_v38, %v182_v40  ;;  %v343_v32 = vsel %vm333_vm11, %v329_v25, 1326507024 }
  0xcd   :  { %v1015_v7 = vadd.s32 %v213_v62, %v204_v63  ;;  %v236_v30 = vadd.s32 %v235_v26, %v226_v22  ;;  %v341_v31 = vsel %vm331_vm13, %v338_v53, %v340_v27  ;;  %v344_v36 = vsel %vm332_vm12, %v326_v19, %v343_v32 }
  0xce   :  { %v347_v37 = vand.u32 65535, %v946_v5  ;;  %v371_v43 = vand.u32 65535, %v341_v31  ;;  %v345_v61 = vsel %vm331_vm13, %v342_v28, %v344_v36  ;;  %v348_v38 = vshrl.u32 %v946_v5, 16 }
  0xcf   :  { %vm239_vm14 = vc.u32 %v1015_v7, %v1004_v23  ;;  %v240_v44 = vadd.s32 1, %v236_v30  ;;  %v372_v40 = vshrl.u32 %v341_v31, 16  ;;  %v237_v46 = vmul.u32 %v936_v52, %v183_v29 }
  0xd0   :  { %v349_v47 = vand.u32 65535, %v345_v61  ;;  %v350_v48 = vshrl.u32 %v345_v61, 16  ;;  %v375_v54 = vmul.u32 %v371_v43, %v348_v38  ;;  %v373_v51 = vmul.u32 %v371_v43, %v347_v37 }
  0xd1   :  { %v241_v49 = vsel %vm239_vm14, %v240_v44, %v236_v30  ;;  %v374_v50 = vmul.u32 %v372_v40, %v347_v37  ;;  %v376_v60 = vmul.u32 %v372_v40, %v348_v38  ;;  %v335_v18 = vsel %vm333_vm11, %v990_v4, 2102212464 }
  0xd2   :  { %v242_v56 = vadd.s32 %v241_v49, %v237_v46  ;;  %v352_v57 = vmul.u32 %v350_v48, %v347_v37  ;;  %v353_v58 = vmul.u32 %v349_v47, %v348_v38  ;;  %v351_v2 = vmul.u32 %v349_v47, %v347_v37 }
  0xd3   :  { %v377_v63 = vshll.u32 %v374_v50, 16  ;;  %v354_v3 = vmul.u32 %v350_v48, %v348_v38  ;;  %v379_v59 = vshll.u32 %v375_v54, 16  ;;  %v314_v22 = vshrl.u32 %v895_v55, %v953_v14 }
  0xd4   :  { %v243_v1 = vadd.s32 536870912, %v242_v56  ;;  %v355_v8 = vshll.u32 %v352_v57, 16  ;;  %v357_v11 = vshll.u32 %v353_v58, 16  ;;  %v356_v25 = vshrl.u32 %v352_v57, 16 }
  0xd5   :  { %vm381_vm15 = vc.u32 %v373_v51, %v377_v63  ;;  %v383_v12 = vadd.s32 %v377_v63, %v373_v51  ;;  %v378_v26 = vshrl.u32 %v374_v50, 16  ;;  %v334_v0 = vsel %vm330_vm10, %v314_v22, %v983_v42 }
  0xd6   :  { %v1040_v52 = vshrl.u32 %v243_v1, 30  ;;  %vm359_vm0 = vc.u32 %v351_v2, %v355_v8  ;;  %v361_v9 = vadd.s32 %v355_v8, %v351_v2  ;;  %v382_v10 = vsel %vm381_vm15, 1, %v901_v6 }
  0xd7   :  { %v360_v13 = vsel %vm359_vm0, 1, %v901_v6  ;;  %v384_v15 = vadd.s32 %v382_v10, %v376_v60  ;;  %vm385_vm1 = vc.u32 %v383_v12, %v379_v59  ;;  %v336_v4 = vsel %vm332_vm12, %v985_v45, %v335_v18 }
  0xd8   :  { %v245_v16 = vshll.u32 %v1040_v52, 30  ;;  %v362_v17 = vadd.s32 %v360_v13, %v354_v3  ;;  %vm363_vm2 = vc.u32 %v361_v9, %v357_v11  ;;  %v386_v20 = vsel %vm385_vm1, 1, %v901_v6 }
  0xd9   :  { %v364_v19 = vsel %vm363_vm2, 1, %v901_v6  ;;  %v388_v62 = vadd.s32 %v386_v20, %v384_v15  ;;  %v358_v27 = vshrl.u32 %v353_v58, 16  ;;  %v380_v28 = vshrl.u32 %v375_v54, 16 }
  0xda   :  { %v246_v21 = vsub.s32 %v242_v56, %v245_v16  ;;  %v366_v24 = vadd.s32 %v364_v19, %v362_v17  ;;  %v337_v32 = vsel %vm331_vm13, %v334_v0, %v336_v4  ;;  %v387_v36 = vadd.s32 %v383_v12, %v379_v59 }
  0xdb   :  { %v389_v29 = vadd.s32 %v388_v62, %v378_v26  ;;  %v391_v42 = vmul.u32 %v946_v5, %v337_v32  ;;  %v238_v61 = vadd.s32 %v1004_v23, %v1015_v7  ;;  %vm146_vm7 = vcmp.lt.s32.totalorder %v924_v33, 0 }
  0xdc   :  { %vm247_vm3 = vcmp.lt.s32.totalorder %v246_v21, 0  ;;  %v248_v53 = vsub.s32 0, %v246_v21  ;;  %v367_v6 = vadd.s32 %v366_v24, %v356_v25  ;;  %vm1066_vm8 = vcmp.le.f32.partialorder %v144_v35, 0.7853982 }
  0xdd   :  { %v390_v31 = vadd.s32 %v389_v29, %v380_v28  ;;  %v268_v0 = vsub.s32 4, %v1040_v52  ;;  %v115_v29 = vlaneseq  ;;  %vm1078_vm10 = vcmp.le.f32.partialorder %v298_v39, 0.7853982 }
  0xde   :  { %v249_v30 = vsel %vm247_vm3, %v248_v53, %v246_v21  ;;  %v368_v14 = vadd.s32 %v367_v6, %v358_v27  ;;  %vm300_vm11 = vcmp.lt.s32.totalorder %v926_v34, 0  ;;  %vm287_vm12 = vweird.f32 %v924_v33 }
  0xdf   :  { %v250_v55 = vclz %v249_v30  ;;  %v394_v43 = vadd.s32 1, %v390_v31 }
  0xe0   :  { %vm393_vm4 = vc.u32 %v368_v14, %v387_v36  ;;  %v392_v13 = vadd.s32 %v387_v36, %v368_v14 }
  0xe1   :  { %v790_v37 = vadd.s32 4294967294, %v250_v55  ;;  %v395_v45 = vsel %vm393_vm4, %v394_v43, %v390_v31  ;;  %v269_v55 = vsel %vm146_vm7, %v268_v0, %v1040_v52 }
  0xe2   :  { %v396_v46 = vadd.s32 %v395_v45, %v391_v42  ;;  %v271_v39 = vsel %vm1066_vm8, 0, %v269_v55  ;;  %v116_v42 = vand.u32 127, %v115_v29 }
  0xe3   :  { %vm791_vm5 = vcmp.lt.s32.totalorder %v790_v37, 0 }
  0xe4   :  { %v253_v44 = vsel %vm791_vm5, 0, %v790_v37  ;;  %v397_v41 = vadd.s32 536870912, %v396_v46 }
  0xe5   :  { %v254_v38 = vsub.s32 32, %v253_v44  ;;  %v258_v40 = vsub.s32 4294967266, %v253_v44  ;;  %v255_v47 = vshll.u32 %v246_v21, %v253_v44 }
  0xe6   :  { %v398_v56 = vshrl.u32 %v397_v41, 30 }
  0xe7   :  { %v256_v48 = vshrl.u32 %v238_v61, %v254_v38  ;;  %v259_v49 = vadd.s32 127, %v258_v40 }
  0xe8   :  { %v399_v58 = vshll.u32 %v398_v56, 30  ;;  %v422_v32 = vsub.s32 4, %v398_v56 }
  0xe9   :  { %v257_v50 = vor.u32 %v256_v48, %v255_v47  ;;  %v260_v54 = vshll.u32 %v259_v49, 23  ;;  %v596_v47 = vadd.s32 3, %v271_v39  ;;  %v117_v48 = vadd.s32 128, %v116_v42 }
  0xea   :  { %v400_v5 = vsub.s32 %v396_v46, %v399_v58  ;;  %v423_v45 = vsel %vm300_vm11, %v422_v32, %v398_v56 }
  0xeb   :  { %v261_v57 = vor.u32 4788187, %v260_v54  ;;  %v264_v60 = vcvt.s32.f32 %v257_v50  ;;  %v425_v49 = vsel %vm1078_vm10, 0, %v423_v45  ;;  %v129_v56 = vand.u32 63, %v117_v48 }
  0xec   :  { %vm401_vm6 = vcmp.lt.s32.totalorder %v400_v5, 0  ;;  %v402_v1 = vsub.s32 0, %v400_v5 }
  0xed   :  { %v262_v51 = vand.u32 2147483647, %v261_v57  ;;  %v288_v57 = vand.u32 3, %v271_v39  ;;  %vm1094_vm3 = vcmp.lt.s32.totalorder %v129_v56, 32 }
  0xee   :  { %v403_v23 = vsel %vm401_vm6, %v402_v1, %v400_v5 }
  0xef   :  { %v265_v63 = vmul.f32 %v264_v60, %v262_v51  ;;  %v404_v7 = vclz %v403_v23  ;;  %vm289_vm13 = vcmp.lt.s32.totalorder %v288_v57, 2  ;;  %vm290_vm14 = vcmp.eq.s32.totalorder %v288_v57, 0 }
  0xf0   :  { %vm293_vm15 = vcmp.eq.s32.totalorder %v288_v57, 2 }
  0xf1   :  { %v266_v2 = vxor.u32 2147483648, %v265_v63  ;;  %v793_v59 = vadd.s32 4294967294, %v404_v7  ;;  %v442_v7 = vand.u32 3, %v425_v49 }
  0xf3   :  { %v267_v8 = vsel %vm146_vm7, %v266_v2, %v265_v63  ;;  %vm794_vm9 = vcmp.lt.s32.totalorder %v793_v59, 0  ;;  %v597_v63 = vand.u32 3, %v596_v47  ;;  %vm443_vm4 = vcmp.lt.s32.totalorder %v442_v7, 2 }
  0xf4   :  { %v270_v11 = vsel %vm1066_vm8, %v924_v33, %v267_v8  ;;  %v407_v10 = vsel %vm794_vm9, 0, %v793_v59  ;;  %vm444_vm5 = vcmp.eq.s32.totalorder %v442_v7, 0  ;;  %vm447_vm6 = vcmp.eq.s32.totalorder %v442_v7, 2 }
  0xf5   :  { %v272_v12 = vmul.f32 %v270_v11, %v270_v11  ;;  %v408_v15 = vsub.s32 32, %v407_v10  ;;  %v412_v16 = vsub.s32 4294967266, %v407_v10  ;;  %v409_v35 = vshll.u32 %v400_v5, %v407_v10 }
  0xf6   :  { %v751_v5 = vadd.s32 3, %v425_v49  ;;  %vm598_vm0 = vcmp.lt.s32.totalorder %v597_v63, 2  ;;  %vm599_vm1 = vcmp.eq.s32.totalorder %v597_v63, 0  ;;  %vm602_vm2 = vcmp.eq.s32.totalorder %v597_v63, 2 }
  0xf7   :  { %v280_v9 = vmul.f32 -0.00019511016, %v272_v12  ;;  %v410_v18 = vshrl.u32 %v392_v13, %v408_v15  ;;  %v413_v19 = vadd.s32 127, %v412_v16  ;;  %v273_v20 = vmul.f32 -0.001358992, %v272_v12 }
  0xf8   :  { %v752_v59 = vand.u32 3, %v751_v5  ;;  %v122_v16 = vand.u32 63, %v116_v42 }
  0xf9   :  { %v281_v17 = vadd.f32 0.008332121, %v280_v9  ;;  %v411_v21 = vor.u32 %v410_v18, %v409_v35  ;;  %v414_v22 = vshll.u32 %v413_v19, 23  ;;  %v274_v25 = vadd.f32 0.041655596, %v273_v20 }
  0xfa   :  { %vm753_vm7 = vcmp.lt.s32.totalorder %v752_v59, 2  ;;  %vm754_vm8 = vcmp.eq.s32.totalorder %v752_v59, 0  ;;  %vm757_vm9 = vcmp.eq.s32.totalorder %v752_v59, 2 }
  0xfb   :  { %v282_v24 = vmul.f32 %v281_v17, %v272_v12  ;;  %v415_v62 = vor.u32 4788187, %v414_v22  ;;  %v418_v53 = vcvt.s32.f32 %v411_v21  ;;  %v275_v6 = vmul.f32 %v274_v25, %v272_v12 }
  0xfd   :  { %v416_v26 = vand.u32 2147483647, %v415_v62  ;;  %v283_v4 = vadd.f32 -0.16666654, %v282_v24  ;;  %v276_v37 = vadd.f32 -0.4999988, %v275_v6 }
  0xff   :  { %v419_v27 = vmul.f32 %v418_v53, %v416_v26  ;;  %v284_v14 = vmul.f32 %v283_v4, %v272_v12  ;;  %v277_v40 = vmul.f32 %v276_v37, %v272_v12 }
 0x101   :  { %v420_v28 = vxor.u32 2147483648, %v419_v27  ;;  %v285_v44 = vadd.f32 1.0, %v284_v14  ;;  %v278_v58 = vadd.f32 1.0, %v277_v40 }
 0x103   :  { %v421_v31 = vsel %vm300_vm11, %v420_v28, %v419_v27  ;;  %v286_v41 = vmul.f32 %v285_v44, %v270_v11  ;;  %v294_v3 = vxor.u32 2147483648, %v278_v58  ;;  %vm142_vm11 = vcmp.lt.s32.totalorder %v122_v16, 32 }
 0x104   :  { %v424_v36 = vsel %vm1078_vm10, %v926_v34, %v421_v31  ;;  %vm441_vm10 = vweird.f32 %v926_v34 }
 0x105   :  { %v426_v43 = vmul.f32 %v424_v36, %v424_v36  ;;  %v291_v1 = vxor.u32 2147483648, %v286_v41  ;;  %v295_v17 = vsel %vm293_vm15, %v294_v3, %v286_v41  ;;  %v604_v35 = vsel %vm602_vm2, %v294_v3, %v286_v41 }
 0x107   :  { %v427_v61 = vmul.f32 -0.001358992, %v426_v43  ;;  %v434_v38 = vmul.f32 -0.00019511016, %v426_v43  ;;  %v292_v9 = vsel %vm290_vm14, %v278_v58, %v291_v1  ;;  %v601_v10 = vsel %vm599_vm1, %v278_v58, %v291_v1 }
 0x108   :  { %v296_v19 = vsel %vm289_vm13, %v292_v9, %v295_v17  ;;  %v605_v20 = vsel %vm598_vm0, %v601_v10, %v604_v35  ;;  %vm767_vm13 = vcmask 1043456  }
 0x109   :  { %v428_v46 = vadd.f32 0.041655596, %v427_v61  ;;  %v435_v52 = vadd.f32 0.008332121, %v434_v38  ;;  %v297_v53 = vsel %vm287_vm12, nan, %v296_v19  ;;  %v606_v0 = vsel %vm287_vm12, nan, %v605_v20 }
 0x10a   :  { %v762_v28 = vsel %vm142_vm11, %v297_v53, %v606_v0 }
 0x10b   :  { %v429_v50 = vmul.f32 %v428_v46, %v426_v43  ;;  %v436_v54 = vmul.f32 %v435_v52, %v426_v43 }
 0x10d   :  { %v430_v51 = vadd.f32 -0.4999988, %v429_v50  ;;  %v437_v60 = vadd.f32 -0.16666654, %v436_v54 }
 0x10f   :  { %v431_v2 = vmul.f32 %v430_v51, %v426_v43  ;;  %v438_v23 = vmul.f32 %v437_v60, %v426_v43 }
 0x111   :  { %v432_v8 = vadd.f32 1.0, %v431_v2  ;;  %v439_v11 = vadd.f32 1.0, %v438_v23 }
 0x113   :  { %v440_v13 = vmul.f32 %v439_v11, %v424_v36  ;;  %v448_v15 = vxor.u32 2147483648, %v432_v8 }
 0x115   :  { %v445_v18 = vxor.u32 2147483648, %v440_v13  ;;  %v449_v22 = vsel %vm447_vm6, %v448_v15, %v440_v13  ;;  %v759_v62 = vsel %vm757_vm9, %v448_v15, %v440_v13 }
 0x117   :  { %v446_v21 = vsel %vm444_vm5, %v432_v8, %v445_v18  ;;  %v756_v24 = vsel %vm754_vm8, %v432_v8, %v445_v18 }
 0x118   :  { %v450_v25 = vsel %vm443_vm4, %v446_v21, %v449_v22  ;;  %v760_v26 = vsel %vm753_vm7, %v756_v24, %v759_v62 }
 0x119   :  { %v451_v4 = vsel %vm441_vm10, nan, %v450_v25  ;;  %v761_v27 = vsel %vm441_vm10, nan, %v760_v26 }
 0x11a   :  { %v763_v34 = vsel %vm1094_vm3, %v451_v4, %v761_v27 }
 0x11b   :  { %v766_v6 = vrot.slane %v763_v34, 4 }
 0x11d   :  { %v768_v29 = vsel %vm767_vm13, %v762_v28, %v766_v6 }
 0x11e   :  { %770 = vst [vmem:[#allocation7] sm:$0xff] %v768_v29 }
 0x11f   :  { %781 = dma.vmem_to_hbm [thread:$0]  %s777_s1, 128, %s779_s23, [#allocation4]  }
 0x120   :  { %889 = dma.done.wait [#allocation4], 128  }
 0x121   :  { %890 = vsyncadd [#allocation4], 4294967168 }
 0x122   :  { %786 = vsyncpa [#allocation3], 1 }
 0x123   :  { %787 = vsyncpa [#allocation6], 1 }
 0x124   :  { %788 = vsyncpa [#allocation4], 1 }

</bundles_post_ra>
